<compile_context>
chip_gen: v7x
topology: tpu7x:2x2x1
jax: 0.10.0
libtpu: 0.0.40
codegen_flags: <defaults>
</compile_context>

<pallas_src>
import numpy as np

import jax
import jax.numpy as jnp
from jax.experimental import pallas as pl
from jax.experimental.pallas import tpu as pltpu

KS = 3  # 3x3 conv, stride 1, padding 1 ("same")


def _lane_pad_channels(c, w_dim):
    """Smallest channel count >= c such that w_dim * c is a multiple of 128
    (falls back to c if channel padding cannot reach a lane multiple)."""
    lane = w_dim * c
    if lane % 128 == 0:
        return c
    target = ((lane + 127) // 128) * 128
    return target // w_dim if target % w_dim == 0 else c


# ----------------------------------------------------------------------------
# Kernel: the whole ConvGRU stack on a lane-dense (B*H, W*C) activation slab.
# ----------------------------------------------------------------------------
def _make_stack_kernel(hid_list, w_dim, h_dim, batch):
    num_layers = len(hid_list)
    n_rows = batch * h_dim  # batch folded into the matmul M dimension

    def kernel(x_ref, *refs):
        # refs = (w1, b1, w2, b2, ..., o_ref)
        o_ref = refs[-1]

        # Per-image row index: with the batch folded along M, the vertical
        # (kh) shifts must not leak across image boundaries.
        row = jax.lax.broadcasted_iota(jnp.int32, (n_rows, 1), 0) % h_dim
        top = row == 0            # first row of each image: a(h-1) is zero
        bot = row == h_dim - 1    # last row of each image:  a(h+1) is zero

        a = x_ref[...]            # (B*H, W*Cin)  float32
        for l in range(num_layers):
            w_ref, b_ref = refs[2 * l], refs[2 * l + 1]
            hid_c = hid_list[l]
            lane = a.shape[1]

            # Vertical neighbours a(h-1), a(h+1): row shift + boundary mask.
            # (A pltpu.roll(axis=0) would keep the shift on the XLU; the safe
            #  slice+concat form is negligible at these sizes.)
            zero_row = jnp.zeros((1, lane), jnp.float32)
            a_up = jnp.concatenate([zero_row, a[:-1, :]], axis=0)   # a[h-1]
            a_dn = jnp.concatenate([a[1:, :], zero_row], axis=0)    # a[h+1]
            a_up = jnp.where(top, 0.0, a_up)
            a_dn = jnp.where(bot, 0.0, a_dn)

            # kh-fused conv: ONE bf16 MXU matmul per layer.
            #   K = 3*W*Cin (kh taps stacked), N = 2*W*hid (update|out fused).
            a3 = jnp.concatenate([a_up, a, a_dn], axis=1).astype(jnp.bfloat16)
            acc = jnp.dot(a3, w_ref[...], preferred_element_type=jnp.float32)
            acc += b_ref[...]

            half = w_dim * hid_c
            z = 0.5 * (jnp.tanh(0.5 * acc[:, :half]) + 1.0)  # sigmoid (1 EUP op)
            n = jnp.tanh(acc[:, half:])
            a = z * n        # h == 0  =>  (1 - z) * h + z * n  ==  z * n

        o_ref[...] = a.astype(o_ref.dtype)

    return kernel


# ----------------------------------------------------------------------------
# Wrapper: whole stack in one grid-less pallas_call (everything in VMEM).
# ----------------------------------------------------------------------------
def rec_conv_stack(x_nchw, layer_params):
    B, in_c, H, W = x_nchw.shape
    hid_list = [p["hid_c"] for p in layer_params]
    hid_last = hid_list[-1]
    in_c_pad = layer_params[0]["in_c_pad"]

    # NCHW -> channel-last, zero-pad channels so W*in_c_pad is lane aligned,
    # fold the batch into rows: (B*H, W*in_c_pad).
    x_nhwc = jnp.transpose(x_nchw, (0, 2, 3, 1))
    if in_c_pad > in_c:
        x_nhwc = jnp.pad(x_nhwc, ((0, 0), (0, 0), (0, 0), (0, in_c_pad - in_c)))
    x_flat = x_nhwc.reshape(B * H, W * in_c_pad)

    operands = [x_flat]
    for p in layer_params:
        operands += [p["big_w"], p["big_b"]]

    out = pl.pallas_call(
        _make_stack_kernel(hid_list, W, H, B),
        out_shape=jax.ShapeDtypeStruct((B * H, W * hid_last), jnp.float32),
        # Grid-less call: x, all layer weights (bf16) and the output live in
        # VMEM for the single invocation; inter-layer activations never touch
        # HBM.  (On v7x one could instead grid over B with
        # dimension_semantics=("parallel",) to use both TensorCores; per the
        # review the folded M=B*H variant is the default choice here.)
        in_specs=[pl.BlockSpec(memory_space=pltpu.MemorySpace.VMEM)] * len(operands),
        out_specs=pl.BlockSpec(memory_space=pltpu.MemorySpace.VMEM),
    )(*operands)

    # (B*H, W*hid) -> (B, hid, H, W)   (PyTorch NCHW contract)
    return jnp.transpose(out.reshape(B, H, W, hid_last), (0, 3, 1, 2))


# ----------------------------------------------------------------------------
# Parameter setup (mirrors ConvGRUCell.__init__ shapes) + kernel weight prep.
# ----------------------------------------------------------------------------
def init_cell_params(key, in_c, hid_c, w_dim, pad_input_lanes=False):
    cin_full = in_c + hid_c
    ks = jax.random.split(key, 6)

    def conv_w(k):  # PyTorch Conv2d layout: (out_c, in_c_full, kh, kw)
        w = 0.1 * jax.random.normal(k, (hid_c, cin_full, KS, KS), jnp.float32)
        # Round-trip through bf16 so kernel (bf16 weights) and f32 reference
        # use the exact same weight values.
        return w.astype(jnp.bfloat16).astype(jnp.float32)

    def conv_b(k):
        return 0.1 * jax.random.normal(k, (hid_c,), jnp.float32)

    wr, br = conv_w(ks[0]), conv_b(ks[1])   # reset gate: dead code when h == 0
    wz, bz = conv_w(ks[2]), conv_b(ks[3])
    wn, bn = conv_w(ks[4]), conv_b(ks[5])

    in_c_pad = _lane_pad_channels(in_c, w_dim) if pad_input_lanes else in_c

    def band(w_oihw):
        # (O, I_full, kh, kw) -> (KS*W*in_c_pad, W*hid_c) block-banded matrix
        # with the 3 kh taps stacked along K (so the whole 3x3 conv is a single
        # matmul), keeping only the first in_c input channels (the hidden
        # channels only ever see zeros when h == 0).
        w_np = np.asarray(w_oihw)[:, :in_c, :, :]            # (O, in_c, KS, KS)
        m = np.zeros((KS * w_dim * in_c_pad, w_dim * hid_c), np.float32)
        for kh in range(KS):
            base = kh * w_dim * in_c_pad
            for w_out in range(w_dim):
                for kw in range(KS):
                    w_in = w_out + kw - 1
                    if 0 <= w_in < w_dim:
                        r0 = base + w_in * in_c_pad
                        m[r0:r0 + in_c,
                          w_out * hid_c:(w_out + 1) * hid_c] = w_np[:, :, kh, kw].T
        return m

    big_w = jnp.asarray(np.concatenate([band(wz), band(wn)], axis=1),
                        dtype=jnp.bfloat16)                      # exact cast
    big_b = jnp.asarray(
        np.concatenate([np.tile(np.asarray(bz), w_dim),
                        np.tile(np.asarray(bn), w_dim)]).astype(np.float32)[None, :])

    def to_hwio(w):  # (O, I, kh, kw) -> (kh, kw, I, O) for the lax.conv reference
        return jnp.transpose(w, (2, 3, 1, 0))

    return {
        "hid_c": hid_c,
        "in_c_pad": in_c_pad,
        "big_w": big_w,          # (KS*W*in_c_pad, 2*W*hid_c)  bf16
        "big_b": big_b,          # (1, 2*W*hid_c)              f32
        "wr_hwio": to_hwio(wr), "br": br,
        "wz_hwio": to_hwio(wz), "bz": bz,
        "wn_hwio": to_hwio(wn), "bn": bn,
    }


# ----------------------------------------------------------------------------
# Pure-JAX reference (full original semantics, including the h=0 path).
# ----------------------------------------------------------------------------
def ref_cell(x_nhwc, p):
    B, H, W, _ = x_nhwc.shape
    hid_c = p["hid_c"]
    h = jnp.zeros((B, H, W, hid_c), x_nhwc.dtype)
    xc = jnp.concatenate([x_nhwc, h], axis=-1)

    def conv(x, w_hwio, b):
        y = jax.lax.conv_general_dilated(
            x, w_hwio, (1, 1), "SAME",
            dimension_numbers=("NHWC", "HWIO", "NHWC"))
        return y + b.reshape(1, 1, 1, -1)

    r = jax.nn.sigmoid(conv(xc, p["wr_hwio"], p["br"]))
    z = jax.nn.sigmoid(conv(xc, p["wz_hwio"], p["bz"]))
    xc2 = jnp.concatenate([x_nhwc, r * h], axis=-1)
    n = jnp.tanh(conv(xc2, p["wn_hwio"], p["bn"]))
    return (1 - z) * h + z * n


def ref_stack(x_nhwc, layer_params):
    for p in layer_params:
        x_nhwc = ref_cell(x_nhwc, p)
    return x_nhwc


# ----------------------------------------------------------------------------
if __name__ == "__main__":
    key = jax.random.PRNGKey(0)
    B, in_c, H, W = 2, 4, 16, 16
    hid_list = [8, 8]

    k_x, k_p = jax.random.split(key)
    x_nchw = jax.random.normal(k_x, (B, in_c, H, W), jnp.float32)

    params = []
    prev = in_c
    for i, hid in enumerate(hid_list):
        params.append(init_cell_params(jax.random.fold_in(k_p, i), prev, hid, W,
                                       pad_input_lanes=(i == 0)))
        prev = hid

    out_nchw = jax.block_until_ready(rec_conv_stack(x_nchw, params))

    x_nhwc = jnp.transpose(x_nchw, (0, 2, 3, 1))
    ref_nhwc = jax.block_until_ready(ref_stack(x_nhwc, params))
    ref_nchw = jnp.transpose(ref_nhwc, (0, 3, 1, 2))

    assert out_nchw.shape == (B, hid_list[-1], H, W)
    # bf16 weights + bf16 matmul operands (f32 accumulate) vs f32 reference:
    # tolerance loosened per review.
    assert jnp.allclose(out_nchw, ref_nchw, rtol=2e-2, atol=2e-2), (
        float(jnp.max(jnp.abs(out_nchw - ref_nchw))))

    print("KERNEL_OK")
</pallas_src>

<mosaic_0001>
module attributes {stable_mosaic.version = 11 : i64} {
  func.func @kernel(%arg0: memref<32x128xf32, #tpu.memory_space<vmem>>, %arg1: memref<384x256xbf16, #tpu.memory_space<vmem>>, %arg2: memref<1x256xf32, #tpu.memory_space<vmem>>, %arg3: memref<384x256xbf16, #tpu.memory_space<vmem>>, %arg4: memref<1x256xf32, #tpu.memory_space<vmem>>, %arg5: memref<32x128xf32, #tpu.memory_space<vmem>>) attributes {dimension_semantics = [], scalar_prefetch = 0 : i64, scratch_operands = 0 : i64, tpu.core_type = #tpu.core_type<tc>} {
    %0 = tpu.iota {dimensions = array<i32: 0>} : vector<32x1xi32>
    %c16_i32 = arith.constant 16 : i32
    %c0_i32 = arith.constant 0 : i32
    %1 = arith.cmpi eq, %c16_i32, %c0_i32 : i32
    %c1_i32 = arith.constant 1 : i32
    %2 = arith.select %1, %c1_i32, %c16_i32 : i32
    %3 = vector.broadcast %2 : i32 to vector<32x1xi32>
    %4 = arith.remsi %0, %3 : vector<32x1xi32>
    %c0_i32_0 = arith.constant 0 : i32
    %5 = vector.broadcast %c0_i32_0 : i32 to vector<32x1xi32>
    %6 = arith.cmpi ne, %4, %5 : vector<32x1xi32>
    %c0_i32_1 = arith.constant 0 : i32
    %7 = vector.broadcast %c0_i32_1 : i32 to vector<32x1xi32>
    %8 = arith.cmpi slt, %4, %7 : vector<32x1xi32>
    %c0_i32_2 = arith.constant 0 : i32
    %9 = arith.cmpi slt, %2, %c0_i32_2 : i32
    %10 = vector.broadcast %9 : i1 to vector<32x1xi1>
    %11 = vector.broadcast %10 : vector<32x1xi1> to vector<32x1xi1>
    %12 = arith.xori %8, %11 : vector<32x1xi1>
    %13 = arith.andi %12, %6 : vector<32x1xi1>
    %14 = vector.broadcast %2 : i32 to vector<32x1xi32>
    %15 = arith.addi %4, %14 : vector<32x1xi32>
    %16 = arith.select %13, %15, %4 : vector<32x1xi1>, vector<32x1xi32>
    %c0_i32_3 = arith.constant 0 : i32
    %17 = vector.broadcast %c0_i32_3 : i32 to vector<32x1xi32>
    %18 = arith.cmpi eq, %16, %17 : vector<32x1xi32>
    %c15_i32 = arith.constant 15 : i32
    %19 = vector.broadcast %c15_i32 : i32 to vector<32x1xi32>
    %20 = arith.cmpi eq, %16, %19 : vector<32x1xi32>
    %c0 = arith.constant 0 : index
    %c0_4 = arith.constant 0 : index
    %21 = vector.load %arg0[%c0, %c0_4] : memref<32x128xf32, #tpu.memory_space<vmem>>, vector<32x128xf32>
    %cst = arith.constant 0.000000e+00 : f32
    %22 = vector.broadcast %cst : f32 to vector<1x128xf32>
    %23 = vector.extract_strided_slice %21 {offsets = [0, 0], sizes = [31, 128], strides = [1, 1]} : vector<32x128xf32> to vector<31x128xf32>
    %24 = tpu.concatenate %22, %23 in 0 : vector<1x128xf32>, vector<31x128xf32> -> vector<32x128xf32>
    %25 = vector.extract_strided_slice %21 {offsets = [1, 0], sizes = [31, 128], strides = [1, 1]} : vector<32x128xf32> to vector<31x128xf32>
    %26 = tpu.concatenate %25, %22 in 0 : vector<31x128xf32>, vector<1x128xf32> -> vector<32x128xf32>
    %cst_5 = arith.constant 0.000000e+00 : f32
    %27 = vector.shape_cast %18 : vector<32x1xi1> to vector<32x1xi1>
    %28 = vector.broadcast %27 : vector<32x1xi1> to vector<32x128xi1>
    %29 = vector.broadcast %cst_5 : f32 to vector<32x128xf32>
    %30 = arith.select %28, %29, %24 : vector<32x128xi1>, vector<32x128xf32>
    %cst_6 = arith.constant 0.000000e+00 : f32
    %31 = vector.shape_cast %20 : vector<32x1xi1> to vector<32x1xi1>
    %32 = vector.broadcast %31 : vector<32x1xi1> to vector<32x128xi1>
    %33 = vector.broadcast %cst_6 : f32 to vector<32x128xf32>
    %34 = arith.select %32, %33, %26 : vector<32x128xi1>, vector<32x128xf32>
    %35 = tpu.concatenate %30, %21, %34 in 1 : vector<32x128xf32>, vector<32x128xf32>, vector<32x128xf32> -> vector<32x384xf32>
    %36 = arith.truncf %35 : vector<32x384xf32> to vector<32x384xbf16>
    %c0_7 = arith.constant 0 : index
    %c0_8 = arith.constant 0 : index
    %37 = vector.load %arg1[%c0_7, %c0_8] : memref<384x256xbf16, #tpu.memory_space<vmem>>, vector<384x256xbf16>
    %cst_9 = arith.constant dense<0.000000e+00> : vector<32x256xf32>
    %38 = tpu.matmul %36, %37, %cst_9 {dimension_numbers = #tpu.dot_dimension_numbers<[1], [0], [0], [1], [0, 0, 1, 1], [], []>} : vector<32x384xbf16>, vector<384x256xbf16>, vector<32x256xf32> -> vector<32x256xf32>
    %c0_10 = arith.constant 0 : index
    %c0_11 = arith.constant 0 : index
    %39 = vector.load %arg2[%c0_10, %c0_11] : memref<1x256xf32, #tpu.memory_space<vmem>>, vector<1x256xf32>
    %40 = vector.broadcast %39 : vector<1x256xf32> to vector<32x256xf32>
    %41 = arith.addf %38, %40 : vector<32x256xf32>
    %42 = vector.extract_strided_slice %41 {offsets = [0, 0], sizes = [32, 128], strides = [1, 1]} : vector<32x256xf32> to vector<32x128xf32>
    %cst_12 = arith.constant 5.000000e-01 : f32
    %43 = vector.broadcast %cst_12 : f32 to vector<32x128xf32>
    %44 = arith.mulf %43, %42 : vector<32x128xf32>
    %45 = math.tanh %44 : vector<32x128xf32>
    %cst_13 = arith.constant 1.000000e+00 : f32
    %46 = vector.broadcast %cst_13 : f32 to vector<32x128xf32>
    %47 = arith.addf %45, %46 : vector<32x128xf32>
    %cst_14 = arith.constant 5.000000e-01 : f32
    %48 = vector.broadcast %cst_14 : f32 to vector<32x128xf32>
    %49 = arith.mulf %48, %47 : vector<32x128xf32>
    %50 = vector.extract_strided_slice %41 {offsets = [0, 128], sizes = [32, 128], strides = [1, 1]} : vector<32x256xf32> to vector<32x128xf32>
    %51 = math.tanh %50 : vector<32x128xf32>
    %52 = arith.mulf %49, %51 : vector<32x128xf32>
    %cst_15 = arith.constant 0.000000e+00 : f32
    %53 = vector.broadcast %cst_15 : f32 to vector<1x128xf32>
    %54 = vector.extract_strided_slice %52 {offsets = [0, 0], sizes = [31, 128], strides = [1, 1]} : vector<32x128xf32> to vector<31x128xf32>
    %55 = tpu.concatenate %53, %54 in 0 : vector<1x128xf32>, vector<31x128xf32> -> vector<32x128xf32>
    %56 = vector.extract_strided_slice %52 {offsets = [1, 0], sizes = [31, 128], strides = [1, 1]} : vector<32x128xf32> to vector<31x128xf32>
    %57 = tpu.concatenate %56, %53 in 0 : vector<31x128xf32>, vector<1x128xf32> -> vector<32x128xf32>
    %cst_16 = arith.constant 0.000000e+00 : f32
    %58 = vector.shape_cast %18 : vector<32x1xi1> to vector<32x1xi1>
    %59 = vector.broadcast %58 : vector<32x1xi1> to vector<32x128xi1>
    %60 = vector.broadcast %cst_16 : f32 to vector<32x128xf32>
    %61 = arith.select %59, %60, %55 : vector<32x128xi1>, vector<32x128xf32>
    %cst_17 = arith.constant 0.000000e+00 : f32
    %62 = vector.shape_cast %20 : vector<32x1xi1> to vector<32x1xi1>
    %63 = vector.broadcast %62 : vector<32x1xi1> to vector<32x128xi1>
    %64 = vector.broadcast %cst_17 : f32 to vector<32x128xf32>
    %65 = arith.select %63, %64, %57 : vector<32x128xi1>, vector<32x128xf32>
    %66 = tpu.concatenate %61, %52, %65 in 1 : vector<32x128xf32>, vector<32x128xf32>, vector<32x128xf32> -> vector<32x384xf32>
    %67 = arith.truncf %66 : vector<32x384xf32> to vector<32x384xbf16>
    %c0_18 = arith.constant 0 : index
    %c0_19 = arith.constant 0 : index
    %68 = vector.load %arg3[%c0_18, %c0_19] : memref<384x256xbf16, #tpu.memory_space<vmem>>, vector<384x256xbf16>
    %cst_20 = arith.constant dense<0.000000e+00> : vector<32x256xf32>
    %69 = tpu.matmul %67, %68, %cst_20 {dimension_numbers = #tpu.dot_dimension_numbers<[1], [0], [0], [1], [0, 0, 1, 1], [], []>} : vector<32x384xbf16>, vector<384x256xbf16>, vector<32x256xf32> -> vector<32x256xf32>
    %c0_21 = arith.constant 0 : index
    %c0_22 = arith.constant 0 : index
    %70 = vector.load %arg4[%c0_21, %c0_22] : memref<1x256xf32, #tpu.memory_space<vmem>>, vector<1x256xf32>
    %71 = vector.broadcast %70 : vector<1x256xf32> to vector<32x256xf32>
    %72 = arith.addf %69, %71 : vector<32x256xf32>
    %73 = vector.extract_strided_slice %72 {offsets = [0, 0], sizes = [32, 128], strides = [1, 1]} : vector<32x256xf32> to vector<32x128xf32>
    %cst_23 = arith.constant 5.000000e-01 : f32
    %74 = vector.broadcast %cst_23 : f32 to vector<32x128xf32>
    %75 = arith.mulf %74, %73 : vector<32x128xf32>
    %76 = math.tanh %75 : vector<32x128xf32>
    %cst_24 = arith.constant 1.000000e+00 : f32
    %77 = vector.broadcast %cst_24 : f32 to vector<32x128xf32>
    %78 = arith.addf %76, %77 : vector<32x128xf32>
    %cst_25 = arith.constant 5.000000e-01 : f32
    %79 = vector.broadcast %cst_25 : f32 to vector<32x128xf32>
    %80 = arith.mulf %79, %78 : vector<32x128xf32>
    %81 = vector.extract_strided_slice %72 {offsets = [0, 128], sizes = [32, 128], strides = [1, 1]} : vector<32x256xf32> to vector<32x128xf32>
    %82 = math.tanh %81 : vector<32x128xf32>
    %83 = arith.mulf %80, %82 : vector<32x128xf32>
    %c0_26 = arith.constant 0 : index
    %c0_27 = arith.constant 0 : index
    %84 = vector.load %arg5[%c0_26, %c0_27] : memref<32x128xf32, #tpu.memory_space<vmem>>, vector<32x128xf32>
    tpu.vector_store %arg5[%c0_26, %c0_27], %83 {strides = array<i32>} : memref<32x128xf32, #tpu.memory_space<vmem>>, vector<32x128xf32>,
    return
  }
}

</mosaic_0001>

<bundles_post_ra>
// kernel: tpu_custom_call.1
= control target key start
LH: loop header
LB: loop body
LE: loop exit
PB: predicated region body
PF: predicated region fallthrough
CT: control target
= control target key end

     0   :  { %10 = vsyncpa [#allocation3], 0  ;;  %s1770_s0 = inlined_call_operand.hbm [shape: f32[32,128], index: 0, kind: input, shape index: {}]   ;;  %s1771_s1 = inlined_call_operand.hbm [shape: bf16[384,256], index: 1, kind: input, shape index: {}]   ;;  %s1772_s2 = inlined_call_operand.vmem [shape: f32[1,256], index: 2, kind: input, shape index: {}]   ;;  %s1773_s3 = inlined_call_operand.hbm [shape: bf16[384,256], index: 3, kind: input, shape index: {}]   ;;  %s1774_s4 = inlined_call_operand.vmem [shape: f32[1,256], index: 4, kind: input, shape index: {}]   ;;  %s1775_s5 = inlined_call_operand.hbm [shape: f32[32,128], index: 5, kind: output, shape index: {}]  }
   0x1   :  { %11 = vsyncpa [#allocation6], 0 }
   0x2   :  { %12 = vsyncpa [#allocation4], 0  ;;  %s1554_s18 = smov [#allocation5]   ;;  %s1555_s20 = smov [#allocation2]  }
   0x3   :  { %s30_s19 = sshll.u32 %s1554_s18, 4  ;;  %s18_s21 = sshll.u32 %s1555_s20, 4  ;;  %s31_s19 = int_to_ptr.vmem [resolvable:$true] %s30_s19  ;;  %s1592_s21 = int_to_ptr.vmem [resolvable:$true] %s18_s21 }
   0x4   :  { %s1460_s24 = scalar_lea.hbm %s1771_s1, 6144 }
   0x5   :  { %p1461_p0 = scmp.ne.s32.totalorder %s1771_s1, %s1460_s24  ;;  %p1464_p1 = scmp.lt.u32.totalorder %s1460_s24, %s1771_s1 }
   0x7   :  { %p1466_p2 = pnand %p1464_p1, %p1461_p0 }
   0x9   :  { %1469 = shalt.err (!%p1466_p2)
}
   0xa   :  { %s1470_s29 = scalar_lea.vmem %s31_s19, 6144  ;;  %p1475_p4 = scmp.lt.s32.totalorder %s31_s19, %s31_s19 }
   0xb   :  { %p1471_p3 = scmp.ne.s32.totalorder %s31_s19, %s1470_s29  ;;  %p1476_p5 = scmp.lt.s32.totalorder %s1470_s29, %s1470_s29 }
   0xd   :  { %p1477_p6 = por %p1476_p5, %p1475_p4 }
   0xf   :  { %p1478_p7 = pnand %p1477_p6, %p1471_p3 }
  0x11   :  { %1481 = shalt.err (!%p1478_p7)
}
  0x12   :  { %s1556_s30 = smov 128   ;;  %s1557_s6 = smov 8  }
  0x13   :  { %36 = dma.hbm_to_vmem [thread:$0]  %s1771_s1, 6144, %s31_s19, [#allocation6], %s1556_s30, %s1556_s30, %s1557_s6  }
  0x14   :  { %s1482_s11 = scalar_lea.hbm %s1770_s0, 512 }
  0x15   :  { %p1483_p8 = scmp.ne.s32.totalorder %s1770_s0, %s1482_s11  ;;  %p1486_p9 = scmp.lt.u32.totalorder %s1482_s11, %s1770_s0 }
  0x17   :  { %p1488_p10 = pnand %p1486_p9, %p1483_p8 }
  0x19   :  { %1491 = shalt.err (!%p1488_p10)
}
  0x1a   :  { %s1492_s16 = scalar_lea.vmem %s1592_s21, 512  ;;  %p1497_p12 = scmp.lt.s32.totalorder %s1592_s21, %s1592_s21 }
  0x1b   :  { %p1493_p11 = scmp.ne.s32.totalorder %s1592_s21, %s1492_s16  ;;  %p1498_p13 = scmp.lt.s32.totalorder %s1492_s16, %s1492_s16 }
  0x1d   :  { %p1499_p0 = por %p1498_p13, %p1497_p12 }
  0x1f   :  { %p1500_p1 = pnand %p1499_p0, %p1493_p11 }
  0x21   :  { %1503 = shalt.err (!%p1500_p1)
}
  0x22   :  { %24 = dma.hbm_to_vmem [thread:$0]  %s1770_s0, 512, %s1592_s21, [#allocation3], %s1556_s30, %s1556_s30, %s1557_s6  }
  0x23   :  { %s1558_s18 = smov [#allocation7]   ;;  %s1504_s23 = scalar_lea.hbm %s1773_s3, 6144 }
  0x24   :  { %s44_s19 = sshll.u32 %s1558_s18, 4  ;;  %p1505_p2 = scmp.ne.s32.totalorder %s1773_s3, %s1504_s23  ;;  %s45_s19 = int_to_ptr.vmem [resolvable:$true] %s44_s19 }
  0x25   :  { %p1508_p3 = scmp.lt.u32.totalorder %s1504_s23, %s1773_s3 }
  0x27   :  { %p1510_p4 = pnand %p1508_p3, %p1505_p2 }
  0x29   :  { %1513 = shalt.err (!%p1510_p4)
}
  0x2a   :  { %s1514_s28 = scalar_lea.vmem %s45_s19, 6144  ;;  %p1519_p6 = scmp.lt.s32.totalorder %s45_s19, %s45_s19 }
  0x2b   :  { %p1515_p5 = scmp.ne.s32.totalorder %s45_s19, %s1514_s28  ;;  %p1520_p7 = scmp.lt.s32.totalorder %s1514_s28, %s1514_s28 }
  0x2d   :  { %p1521_p8 = por %p1520_p7, %p1519_p6 }
  0x2f   :  { %p1522_p9 = pnand %p1521_p8, %p1515_p5 }
  0x31   :  { %1525 = shalt.err (!%p1522_p9)
}
  0x32   :  { %50 = dma.hbm_to_vmem [thread:$0]  %s1773_s3, 6144, %s45_s19, [#allocation6], %s1556_s30, %s1556_s30, %s1557_s6  }
  0x33   :  { %1548 = dma.done.wait [#allocation3], 512  }
  0x34   :  { %1549 = vsyncadd [#allocation3], 4294966784 }
  0x35   :  { %1550 = dma.done.wait [#allocation6], 12288  }
  0x36   :  { %1551 = vsyncadd [#allocation6], 4294955008  ;;  %v1284_v0 = vld [vmem:[#allocation5 + $0x4] ss:$8 sps:$4 sm:$0xff]   ;;  %v1286_v1 = vld [vmem:[#allocation5] ss:$8 sps:$4 sm:$0xff]   ;;  %v63_v46 = vlaneseq }
  0x37   :  { %488 = vmatprep.subr.bf16.mxu0 %v1284_v0  ;;  %v1287_v2 = vld [vmem:[#allocation5 + $0x14] ss:$8 sps:$4 sm:$0xff]   ;;  %v1289_v3 = vld [vmem:[#allocation5 + $0x10] ss:$8 sps:$4 sm:$0xff]   ;;  %v1290_v4 = vld [vmem:[#allocation5 + $0x24] ss:$8 sps:$4 sm:$0xff]  }
  0x38   :  { %489 = vmatpush1.bf16.msra.mxu0 %v1286_v1  ;;  %v1292_v5 = vld [vmem:[#allocation5 + $0x20] ss:$8 sps:$4 sm:$0xff]   ;;  %v1293_v6 = vld [vmem:[#allocation5 + $0x34] ss:$8 sps:$4 sm:$0xff]   ;;  %v1295_v7 = vld [vmem:[#allocation5 + $0x30] ss:$8 sps:$4 sm:$0xff]  }
  0x39   :  { %490 = vmatprep.subr.bf16.mxu0 %v1287_v2  ;;  %v1296_v8 = vld [vmem:[#allocation5 + $0x44] ss:$8 sps:$4 sm:$0xff]   ;;  %v1298_v9 = vld [vmem:[#allocation5 + $0x40] ss:$8 sps:$4 sm:$0xff]   ;;  %v1299_v10 = vld [vmem:[#allocation5 + $0x54] ss:$8 sps:$4 sm:$0xff]  }
  0x3a   :  { %v1301_v11 = vld [vmem:[#allocation5 + $0x50] ss:$8 sps:$4 sm:$0xff]   ;;  %v1302_v12 = vld [vmem:[#allocation5 + $0x64] ss:$8 sps:$4 sm:$0xff]   ;;  %vm145_vm0 = vcmask 1046528   ;;  %v1665_v51 = vshrl.u32 %v63_v46, 7 }
  0x3b   :  { %v1644_v13 = vld [vmem:[#allocation2] sm:$0xff]  ;;  %v1646_v14 = vld [vmem:[#allocation2 + $0x8] sm:$0xff]  ;;  %v1305_v19 = vld [vmem:[#allocation5 + $0x74] ss:$8 sps:$4 sm:$0xff]   ;;  %vm132_vm1 = vcmask 1040384   ;;  %vm1559_vm3 = vmmov 1  }
  0x3c   :  { %491 = vmatpush1.bf16.msra.mxu0 %v1289_v3  ;;  %v146_v15 = vrot.slane %v1644_v13, 1  ;;  %v147_v16 = vrot.slane %v1646_v14, 1  ;;  %v1304_v17 = vld [vmem:[#allocation5 + $0x60] ss:$8 sps:$4 sm:$0xff]   ;;  %v183_v18 = vpack.c.bf16 %v1646_v14, %v1644_v13  ;;  %v1307_v21 = vld [vmem:[#allocation5 + $0x70] ss:$8 sps:$4 sm:$0xff]  }
  0x3d   :  { %492 = vmatprep.subr.bf16.mxu0 %v1290_v4  ;;  %v1308_v22 = vld [vmem:[#allocation5 + $0x84] ss:$8 sps:$4 sm:$0xff]   ;;  %v1655_v23 = vld [vmem:[#allocation2 + $0x10] sm:$0xff]  ;;  %v1310_v24 = vld [vmem:[#allocation5 + $0x80] ss:$8 sps:$4 sm:$0xff]   ;;  %v133_v56 = vrot.slane %v1644_v13, 7 }
  0x3e   :  { %v1653_v20 = vsel %vm145_vm0, %v146_v15, %v147_v16  ;;  %520 = vmatprep.mubr.bf16.mxu0 %v183_v18  ;;  %v149_v25 = vrot.slane %v1655_v23, 1  ;;  %v1311_v26 = vld [vmem:[#allocation5 + $0x94] ss:$8 sps:$4 sm:$0xff]   ;;  %v1313_v28 = vld [vmem:[#allocation5 + $0x90] ss:$8 sps:$4 sm:$0xff]   ;;  %v134_v57 = vrot.slane %v1646_v14, 7 }
  0x3f   :  { %v1314_v30 = vld [vmem:[#allocation5 + $0xa4] ss:$8 sps:$4 sm:$0xff]   ;;  %v1358_v32 = vld [vmem:[#allocation7] ss:$8 sps:$4 sm:$0xff]   ;;  %v1359_v33 = vld [vmem:[#allocation7 + $0x14] ss:$8 sps:$4 sm:$0xff]  }
  0x40   :  { %493 = vmatpush1.bf16.msra.mxu0 %v1292_v5  ;;  %v1661_v27 = vsel %vm145_vm0, %v147_v16, %v149_v25  ;;  %v1356_v31 = vld [vmem:[#allocation7 + $0x4] ss:$8 sps:$4 sm:$0xff]   ;;  %v1361_v34 = vld [vmem:[#allocation7 + $0x10] ss:$8 sps:$4 sm:$0xff]   ;;  %v1316_v35 = vld [vmem:[#allocation5 + $0xa0] ss:$8 sps:$4 sm:$0xff]   ;;  %v135_v62 = vsel %vm132_vm1, %v133_v56, %v134_v57 }
  0x41   :  { %494 = vmatprep.subr.bf16.mxu0 %v1293_v6  ;;  %v1170_v29 = vpack.c.bf16 %v1661_v27, %v1653_v20  ;;  %960 = vmatprep.subr.bf16.mxu1 %v1356_v31  ;;  %v1362_v36 = vld [vmem:[#allocation7 + $0x24] ss:$8 sps:$4 sm:$0xff]   ;;  %v1317_v37 = vld [vmem:[#allocation5 + $0xb4] ss:$8 sps:$4 sm:$0xff]   ;;  %v1364_v38 = vld [vmem:[#allocation7 + $0x20] ss:$8 sps:$4 sm:$0xff]  }
  0x42   :  { %961 = vmatpush1.bf16.msra.mxu1 %v1358_v32  ;;  %v1319_v39 = vld [vmem:[#allocation5 + $0xb0] ss:$8 sps:$4 sm:$0xff]   ;;  %v1365_v40 = vld [vmem:[#allocation7 + $0x34] ss:$8 sps:$4 sm:$0xff]   ;;  %v1320_v41 = vld [vmem:[#allocation5 + $0xc4] ss:$8 sps:$4 sm:$0xff]  }
  0x43   :  { %962 = vmatprep.subr.bf16.mxu1 %v1359_v33  ;;  %v1322_v42 = vld [vmem:[#allocation5 + $0xc0] ss:$8 sps:$4 sm:$0xff]   ;;  %v1323_v43 = vld [vmem:[#allocation5 + $0xd4] ss:$8 sps:$4 sm:$0xff]   ;;  %v1367_v44 = vld [vmem:[#allocation7 + $0x30] ss:$8 sps:$4 sm:$0xff]  }
  0x44   :  { %495 = vmatpush1.bf16.msra.mxu0 %v1295_v7  ;;  %v1368_v45 = vld [vmem:[#allocation7 + $0x44] ss:$8 sps:$4 sm:$0xff]   ;;  %v1370_v47 = vld [vmem:[#allocation7 + $0x40] ss:$8 sps:$4 sm:$0xff]   ;;  %v1325_v48 = vld [vmem:[#allocation5 + $0xd0] ss:$8 sps:$4 sm:$0xff]  }
  0x45   :  { %496 = vmatprep.subr.bf16.mxu0 %v1296_v8  ;;  %v1371_v49 = vld [vmem:[#allocation7 + $0x54] ss:$8 sps:$4 sm:$0xff]   ;;  %v1326_v50 = vld [vmem:[#allocation5 + $0xe4] ss:$8 sps:$4 sm:$0xff]   ;;  %v1373_v52 = vld [vmem:[#allocation7 + $0x50] ss:$8 sps:$4 sm:$0xff]  }
  0x46   :  { %963 = vmatpush1.bf16.msra.mxu1 %v1361_v34  ;;  %v1328_v53 = vld [vmem:[#allocation5 + $0xe0] ss:$8 sps:$4 sm:$0xff]   ;;  %v1374_v54 = vld [vmem:[#allocation7 + $0x64] ss:$8 sps:$4 sm:$0xff]   ;;  %v1329_v55 = vld [vmem:[#allocation5 + $0xf4] ss:$8 sps:$4 sm:$0xff]  }
  0x47   :  { %964 = vmatprep.subr.bf16.mxu1 %v1362_v36  ;;  %v72_v58 = vand.u32 15, %v1665_v51  ;;  %v1376_v59 = vld [vmem:[#allocation7 + $0x60] ss:$8 sps:$4 sm:$0xff]   ;;  %v1331_v60 = vld [vmem:[#allocation5 + $0xf0] ss:$8 sps:$4 sm:$0xff]   ;;  %v144_v61 = vsel %vm132_vm1, 0.0, %v133_v56 }
  0x48   :  { %497 = vmatpush1.bf16.msra.mxu0 %v1298_v9  ;;  %v1377_v63 = vld [vmem:[#allocation7 + $0x74] ss:$8 sps:$4 sm:$0xff]   ;;  %v1334_v0 = vld [vmem:[#allocation5 + $0x104] ss:$8 sps:$4 sm:$0xff]   ;;  %v66_v2 = vadd.s32 16, %v1665_v51  ;;  %v1162_v3 = vpack.c.bf16 %v135_v62, %v144_v61  ;;  %v136_v7 = vrot.slane %v1655_v23, 7 }
  0x49   :  { %498 = vmatprep.subr.bf16.mxu0 %v1299_v10  ;;  %vm1240_vm2 = vcmp.ne.s32.totalorder %v72_v58, 0  ;;  %v1672_v1 = vld [vmem:[#allocation2 + $0x18] sm:$0xff]  ;;  %v1332_v5 = vld [vmem:[#allocation5 + $0x100] ss:$8 sps:$4 sm:$0xff]   ;;  %v1352_v33 = vld [vmem:[#allocation5 + $0x164] ss:$8 sps:$4 sm:$0xff]  }
  0x4a   :  { %965 = vmatpush1.bf16.msra.mxu1 %v1364_v38  ;;  %v1379_v4 = vld [vmem:[#allocation7 + $0x70] ss:$8 sps:$4 sm:$0xff]   ;;  %vm1676_vm4 = vmpackc.low %vm1559_vm3, %vm1240_vm2  ;;  %v138_v8 = vrot.slane %v1672_v1, 7  ;;  %v186_v9 = vpack.c.bf16 %v1672_v1, %v1655_v23  ;;  %v1337_v10 = vld [vmem:[#allocation5 + $0x114] ss:$8 sps:$4 sm:$0xff]   ;;  %v137_v15 = vsel %vm132_vm1, %v134_v57, %v136_v7  ;;  %v65_v34 = vadd.s32 8, %v1665_v51 }
  0x4b   :  { %966 = vmatprep.subr.bf16.mxu1 %v1365_v40  ;;  %v1382_v13 = vld [vmem:[#allocation7 + $0x80] ss:$8 sps:$4 sm:$0xff]   ;;  %v1335_v14 = vld [vmem:[#allocation5 + $0x110] ss:$8 sps:$4 sm:$0xff]   ;;  %v1349_v31 = vld [vmem:[#allocation5 + $0x154] ss:$8 sps:$4 sm:$0xff]  }
  0x4c   :  { %499 = vmatpush1.bf16.msra.mxu0 %v1301_v11  ;;  %v86_v11 = vand.u32 15, %v66_v2  ;;  %v139_v16 = vsel %vm132_vm1, %v136_v7, %v138_v8  ;;  %v1347_v32 = vld [vmem:[#allocation5 + $0x150] ss:$8 sps:$4 sm:$0xff]   ;;  %v1355_v36 = vld [vmem:[#allocation5 + $0x174] ss:$8 sps:$4 sm:$0xff]   ;;  %v151_v40 = vrot.slane %v1672_v1, 1 }
  0x4d   :  { %500 = vmatprep.subr.bf16.mxu0 %v1302_v12  ;;  %v1380_v12 = vld [vmem:[#allocation7 + $0x84] ss:$8 sps:$4 sm:$0xff]   ;;  %v1166_v18 = vpack.c.bf16 %v139_v16, %v137_v15  ;;  %v1353_v38 = vld [vmem:[#allocation5 + $0x170] ss:$8 sps:$4 sm:$0xff]   ;;  %v1383_v20 = vld [vmem:[#allocation7 + $0x94] ss:$8 sps:$4 sm:$0xff]  }
  0x4e   :  { %967 = vmatpush1.bf16.msra.mxu1 %v1367_v44  ;;  %vm1241_vm5 = vcmp.ne.s32.totalorder %v86_v11, 0  ;;  %v157_v44 = vsel %vm145_vm0, %v151_v40, 0.0  ;;  %v1385_v27 = vld [vmem:[#allocation7 + $0x90] ss:$8 sps:$4 sm:$0xff]   ;;  %v1388_v23 = vld [vmem:[#allocation7 + $0xa0] ss:$8 sps:$4 sm:$0xff]  }
  0x4f   :  { %968 = vmatprep.subr.bf16.mxu1 %v1368_v45  ;;  %vm1689_vm6 = vmpackc.low %vm1559_vm3, %vm1241_vm5  ;;  %v1403_v56 = vld [vmem:[#allocation7 + $0xf0] ss:$8 sps:$4 sm:$0xff]   ;;  %v1406_v57 = vld [vmem:[#allocation7 + $0x104] ss:$8 sps:$4 sm:$0xff]   ;;  %v240_v58 = vsub.s32 0, %v1665_v51  ;;  %v244_v61 = vsub.s32 1, %v1665_v51 }
  0x50   :  { %501 = vmatpush1.bf16.msra.mxu0 %v1304_v17  ;;  %v1340_v17 = vld [vmem:[#allocation5 + $0x124] ss:$8 sps:$4 sm:$0xff]  }
  0x51   :  { %502 = vmatprep.subr.bf16.mxu0 %v1305_v19  ;;  %v1338_v19 = vld [vmem:[#allocation5 + $0x120] ss:$8 sps:$4 sm:$0xff]  }
  0x52   :  { %969 = vmatpush1.bf16.msra.mxu1 %v1370_v47  ;;  %v1391_v47 = vld [vmem:[#allocation7 + $0xb0] ss:$8 sps:$4 sm:$0xff]  }
  0x53   :  { %970 = vmatprep.subr.bf16.mxu1 %v1371_v49  ;;  %v1394_v49 = vld [vmem:[#allocation7 + $0xc0] ss:$8 sps:$4 sm:$0xff]  }
  0x54   :  { %503 = vmatpush1.bf16.msra.mxu0 %v1307_v21  ;;  %v1425_v21 = vld [vmem:[#allocation7 + $0x170] ss:$8 sps:$4 sm:$0xff]  }
  0x55   :  { %504 = vmatprep.subr.bf16.mxu0 %v1308_v22  ;;  %v1343_v22 = vld [vmem:[#allocation5 + $0x134] ss:$8 sps:$4 sm:$0xff]  }
  0x56   :  { %971 = vmatpush1.bf16.msra.mxu1 %v1373_v52  ;;  %v1397_v52 = vld [vmem:[#allocation7 + $0xd0] ss:$8 sps:$4 sm:$0xff]  }
  0x57   :  { %972 = vmatprep.subr.bf16.mxu1 %v1374_v54  ;;  %v1400_v54 = vld [vmem:[#allocation7 + $0xe0] ss:$8 sps:$4 sm:$0xff]  }
  0x58   :  { %505 = vmatpush1.bf16.msra.mxu0 %v1310_v24  ;;  %v1341_v24 = vld [vmem:[#allocation5 + $0x130] ss:$8 sps:$4 sm:$0xff]  }
  0x59   :  { %506 = vmatprep.subr.bf16.mxu0 %v1311_v26  ;;  %v1560_v26 = vmov 0  }
  0x5a   :  { %973 = vmatpush1.bf16.msra.mxu1 %v1376_v59  ;;  %v236_v59 = vld [vmem:[%s1772_s2] sm:$0x3] }
  0x5b   :  { %974 = vmatprep.subr.bf16.mxu1 %v1377_v63 }
  0x5c   :  { %507 = vmatpush1.bf16.msra.mxu0 %v1313_v28  ;;  %v1346_v28 = vld [vmem:[#allocation5 + $0x144] ss:$8 sps:$4 sm:$0xff]  }
  0x5d   :  { %508 = vmatprep.subr.bf16.mxu0 %v1314_v30  ;;  %v1344_v30 = vld [vmem:[#allocation5 + $0x140] ss:$8 sps:$4 sm:$0xff]  }
  0x5e   :  { %975 = vmatpush1.bf16.msra.mxu1 %v1379_v4 }
  0x5f   :  { %976 = vmatprep.subr.bf16.mxu1 %v1380_v12 }
  0x60   :  { %509 = vmatpush1.bf16.msra.mxu0 %v1316_v35  ;;  %v1350_v35 = vld [vmem:[#allocation5 + $0x160] ss:$8 sps:$4 sm:$0xff]  }
  0x61   :  { %510 = vmatprep.subr.bf16.mxu0 %v1317_v37  ;;  %v79_v37 = vand.u32 15, %v65_v34 }
  0x62   :  { %977 = vmatpush1.bf16.msra.mxu1 %v1382_v13 }
  0x63   :  { %vm1242_vm7 = vcmp.ne.s32.totalorder %v79_v37, 15  ;;  %978 = vmatprep.subr.bf16.mxu1 %v1383_v20 }
  0x64   :  { %511 = vmatpush1.bf16.msra.mxu0 %v1319_v39  ;;  %v67_v39 = vadd.s32 24, %v1665_v51  ;;  %vm1700_vm8 = vmpackc.low %vm1242_vm7, %vm1559_vm3 }
  0x65   :  { %512 = vmatprep.subr.bf16.mxu0 %v1320_v41 }
  0x66   :  { %979 = vmatpush1.bf16.msra.mxu1 %v1385_v27 }
  0x68   :  { %513 = vmatpush1.bf16.msra.mxu0 %v1322_v42  ;;  %v93_v42 = vand.u32 15, %v67_v39 }
  0x69   :  { %514 = vmatprep.subr.bf16.mxu0 %v1323_v43  ;;  %v152_v43 = vsel %vm145_vm0, %v149_v25, %v151_v40  ;;  %v1389_v25 = vld [vmem:[#allocation7 + $0xb4] ss:$8 sps:$4 sm:$0xff]  }
  0x6a   :  { %vm1243_vm9 = vcmp.ne.s32.totalorder %v93_v42, 15  ;;  %v1174_v45 = vpack.c.bf16 %v157_v44, %v152_v43 }
  0x6b   :  { %vm1715_vm10 = vmpackc.low %vm1243_vm9, %vm1559_vm3 }
  0x6c   :  { %515 = vmatpush1.bf16.msra.mxu0 %v1325_v48  ;;  %v1392_v48 = vld [vmem:[#allocation7 + $0xc4] ss:$8 sps:$4 sm:$0xff]  }
  0x6d   :  { %516 = vmatprep.subr.bf16.mxu0 %v1326_v50  ;;  %v1395_v50 = vld [vmem:[#allocation7 + $0xd4] ss:$8 sps:$4 sm:$0xff]  }
  0x70   :  { %517 = vmatpush1.bf16.msra.mxu0 %v1328_v53  ;;  %v1398_v53 = vld [vmem:[#allocation7 + $0xe4] ss:$8 sps:$4 sm:$0xff]  }
  0x71   :  { %518 = vmatprep.subr.bf16.mxu0 %v1329_v55  ;;  %v1401_v55 = vld [vmem:[#allocation7 + $0xf4] ss:$8 sps:$4 sm:$0xff]  }
  0x74   :  { %519 = vmatpush1.bf16.msra.mxu0 %v1331_v60  ;;  %v241_v60 = vrot.slane %v236_v59, %v240_v58 }
  0x75   :  { %541 = vmatprep.subr.bf16.mxu0 %v1334_v0  ;;  %v245_v0 = vrot.slane %v236_v59, %v244_v61 }
  0x77   :  { %1163 = vmatmul.mubr.msk.bf16.vlgmr.msra.gmra.mrb[0].mxu0 %vm1676_vm4, %v1162_v3 }
  0x78   :  { %542 = vmatpush1.bf16.msra.mxu0 %v1332_v5  ;;  %530 = vmatprep.mubr.bf16.mxu0 %v186_v9 }
  0x79   :  { %543 = vmatprep.subr.bf16.mxu0 %v1337_v10 }
  0x7c   :  { %544 = vmatpush1.bf16.msra.mxu0 %v1335_v14 }
  0x7d   :  { %545 = vmatprep.subr.bf16.mxu0 %v1340_v17 }
  0x7f   :  { %1167 = vmatmul.mubr.msk.bf16.gmra.mrb[4].mxu0 %vm1689_vm6, %v1166_v18 }
  0x80   :  { %546 = vmatpush1.bf16.msra.mxu0 %v1338_v19  ;;  %573 = vmatprep.mubr.bf16.mxu0 %v1560_v26 }
  0x81   :  { %547 = vmatprep.subr.bf16.mxu0 %v1343_v22 }
  0x84   :  { %548 = vmatpush1.bf16.msra.mxu0 %v1341_v24 }
  0x85   :  { %549 = vmatprep.subr.bf16.mxu0 %v1346_v28 }
  0x88   :  { %550 = vmatpush1.bf16.msra.mxu0 %v1344_v30 }
  0x89   :  { %551 = vmatprep.subr.bf16.mxu0 %v1349_v31 }
  0x8c   :  { %552 = vmatpush1.bf16.msra.mxu0 %v1347_v32 }
  0x8d   :  { %553 = vmatprep.subr.bf16.mxu0 %v1352_v33 }
  0x90   :  { %554 = vmatpush1.bf16.msra.mxu0 %v1350_v35 }
  0x91   :  { %555 = vmatprep.subr.bf16.mxu0 %v1355_v36 }
  0x94   :  { %556 = vmatpush1.bf16.msra.mxu0 %v1353_v38 }
  0x97   :  { %1171 = vmatmul.mubr.msk.bf16.vlgmr.msra.gmra.mrb[0].mxu0 %vm1700_vm8, %v1170_v29  ;;  %v1386_v29 = vld [vmem:[#allocation7 + $0xa4] ss:$8 sps:$4 sm:$0xff]  }
  0x98   :  { %583 = vmatprep.mubr.bf16.mxu0 %v1560_v26  ;;  %980 = vmatprep.subr.bf16.mxu1 %v1386_v29 }
  0x99   :  { %981 = vmatpush1.bf16.msra.mxu1 %v1388_v23 }
  0x9a   :  { %982 = vmatprep.subr.bf16.mxu1 %v1389_v25  ;;  %v1404_v25 = vld [vmem:[#allocation7 + $0x100] ss:$8 sps:$4 sm:$0xff]  }
  0x9d   :  { %983 = vmatpush1.bf16.msra.mxu1 %v1391_v47 }
  0x9e   :  { %984 = vmatprep.subr.bf16.mxu1 %v1392_v48 }
  0x9f   :  { %1175 = vmatmul.mubr.msk.bf16.gmra.mrb[4].mxu0 %vm1715_vm10, %v1174_v45 }
  0xa1   :  { %985 = vmatpush1.bf16.msra.mxu1 %v1394_v49 }
  0xa2   :  { %986 = vmatprep.subr.bf16.mxu1 %v1395_v50  ;;  %v1409_v50 = vld [vmem:[#allocation7 + $0x114] ss:$8 sps:$4 sm:$0xff]  }
  0xa5   :  { %987 = vmatpush1.bf16.msra.mxu1 %v1397_v52 }
  0xa6   :  { %988 = vmatprep.subr.bf16.mxu1 %v1398_v53 }
  0xa9   :  { %989 = vmatpush1.bf16.msra.mxu1 %v1400_v54 }
  0xaa   :  { %990 = vmatprep.subr.bf16.mxu1 %v1401_v55  ;;  %v1407_v55 = vld [vmem:[#allocation7 + $0x110] ss:$8 sps:$4 sm:$0xff]  }
  0xad   :  { %991 = vmatpush1.bf16.msra.mxu1 %v1403_v56 }
  0xae   :  { %1013 = vmatprep.subr.bf16.mxu1 %v1406_v57 }
 0x16a   :  { %v575_v62 = vpop.f32.mrb[0].mxu0 }
 0x16b   :  { %v1244_v63 = vadd.f32 %v575_v62, %v241_v60  ;;  %v577_v1 = vpop.f32.mrb[1].mxu0 }
 0x16c   :  { %v579_v2 = vpop.f32.mrb[2].mxu0  ;;  %v1245_v7 = vadd.f32 %v577_v1, %v245_v0 }
 0x16d   :  { %v594_v3 = vmul.f32 0.5, %v1244_v63  ;;  %v1246_v4 = vadd.f32 %v579_v2, %v241_v60  ;;  %v581_v5 = vpop.f32.mrb[3].mxu0 }
 0x16e   :  { %v1247_v9 = vadd.f32 %v581_v5, %v245_v0 }
 0x16f   :  { %1428 = vtanh.f32 %v594_v3  ;;  %v595_v8 = vmul.f32 0.5, %v1246_v4  ;;  %v1410_v4 = vld [vmem:[#allocation7 + $0x120] ss:$8 sps:$4 sm:$0xff]  }
 0x171   :  { %1430 = vtanh.f32 %v595_v8 }
 0x172   :  { %v585_v10 = vpop.f32.mrb[4].mxu0  ;;  %1432 = vtanh.f32 %v1245_v7  ;;  %v1415_v7 = vld [vmem:[#allocation7 + $0x134] ss:$8 sps:$4 sm:$0xff]  }
 0x173   :  { %v1248_v11 = vadd.f32 %v585_v10, %v241_v60  ;;  %v587_v12 = vpop.f32.mrb[5].mxu0  ;;  %1434 = vtanh.f32 %v1247_v9 }
 0x174   :  { %v589_v13 = vpop.f32.mrb[6].mxu0  ;;  %v1249_v17 = vadd.f32 %v587_v12, %v245_v0  ;;  %v1418_v12 = vld [vmem:[#allocation7 + $0x144] ss:$8 sps:$4 sm:$0xff]  }
 0x175   :  { %v596_v14 = vmul.f32 0.5, %v1248_v11  ;;  %v1250_v15 = vadd.f32 %v589_v13, %v241_v60  ;;  %v591_v16 = vpop.f32.mrb[7].mxu0  ;;  %v1412_v60 = vld [vmem:[#allocation7 + $0x124] ss:$8 sps:$4 sm:$0xff]   ;;  %v1413_v11 = vld [vmem:[#allocation7 + $0x130] ss:$8 sps:$4 sm:$0xff]  }
 0x176   :  { %v1251_v22 = vadd.f32 %v591_v16, %v245_v0  ;;  %v1416_v13 = vld [vmem:[#allocation7 + $0x140] ss:$8 sps:$4 sm:$0xff]   ;;  %v1424_v16 = vld [vmem:[#allocation7 + $0x164] ss:$8 sps:$4 sm:$0xff]  }
 0x177   :  { %1436 = vtanh.f32 %v596_v14  ;;  %v597_v18 = vmul.f32 0.5, %v1250_v15  ;;  %v1421_v14 = vld [vmem:[#allocation7 + $0x154] ss:$8 sps:$4 sm:$0xff]   ;;  %v1419_v15 = vld [vmem:[#allocation7 + $0x150] ss:$8 sps:$4 sm:$0xff]  }
 0x179   :  { %v1429_v19 = vpop.eup %1428  ;;  %1438 = vtanh.f32 %v597_v18  ;;  %v1427_v18 = vld [vmem:[#allocation7 + $0x174] ss:$8 sps:$4 sm:$0xff]  }
 0x17a   :  { %v602_v24 = vadd.f32 1.0, %v1429_v19  ;;  %1440 = vtanh.f32 %v1249_v17  ;;  %v1422_v17 = vld [vmem:[#allocation7 + $0x160] ss:$8 sps:$4 sm:$0xff]  }
 0x17b   :  { %v1431_v28 = vpop.eup %1430  ;;  %1442 = vtanh.f32 %v1251_v22  ;;  %v708_v19 = vld [vmem:[%s1774_s4] sm:$0x3]  ;;  %s1561_s4 = smov [#allocation8]  }
 0x17c   :  { %v606_v30 = vmul.f32 0.5, %v602_v24  ;;  %v603_v31 = vadd.f32 1.0, %v1431_v28  ;;  %v1433_v32 = vpop.eup %1432  ;;  %v713_v22 = vrot.slane %v708_v19, %v240_v58  ;;  %s1099_s8 = sshll.u32 %s1561_s4, 4  ;;  %s1100_s8 = int_to_ptr.vmem [resolvable:$true] %s1099_s8 }
 0x17d   :  { %v1435_v35 = vpop.eup %1434  ;;  %s1526_s9 = scalar_lea.vmem %s1100_s8, 512  ;;  %p1531_p11 = scmp.lt.s32.totalorder %s1100_s8, %s1100_s8 }
 0x17e   :  { %v607_v33 = vmul.f32 0.5, %v603_v31  ;;  %v614_v34 = vmul.f32 %v1433_v32, %v606_v30  ;;  %v717_v30 = vrot.slane %v708_v19, %v244_v61  ;;  %p1527_p10 = scmp.ne.s32.totalorder %s1100_s8, %s1526_s9  ;;  %p1532_p12 = scmp.lt.s32.totalorder %s1526_s9, %s1526_s9 }
 0x180   :  { %v615_v36 = vmul.f32 %v1435_v35, %v607_v33  ;;  %v622_v37 = vrot.slane %v614_v34, 7  ;;  %v634_v39 = vrot.slane %v614_v34, 1  ;;  %p1533_p13 = por %p1532_p12, %p1531_p11 }
 0x181   :  { %v1437_v38 = vpop.eup %1436 }
 0x182   :  { %v604_v40 = vadd.f32 1.0, %v1437_v38  ;;  %v623_v42 = vrot.slane %v615_v36, 7  ;;  %v635_v43 = vrot.slane %v615_v36, 1  ;;  %v655_v44 = vpack.c.bf16 %v615_v36, %v614_v34  ;;  %p1534_p0 = pnand %p1533_p13, %p1527_p10 }
 0x183   :  { %v1439_v45 = vpop.eup %1438  ;;  %v633_v20 = vsel %vm132_vm1, 0.0, %v622_v37 }
 0x184   :  { %v608_v27 = vmul.f32 0.5, %v604_v40  ;;  %v605_v29 = vadd.f32 1.0, %v1439_v45  ;;  %v636_v23 = vsel %vm145_vm0, %v634_v39, %v635_v43  ;;  %992 = vmatprep.mubr.bf16.mxu1 %v655_v44  ;;  %v624_v47 = vsel %vm132_vm1, %v622_v37, %v623_v42  ;;  %v1441_v48 = vpop.eup %1440 }
 0x185   :  { %v1226_v49 = vpack.c.bf16 %v624_v47, %v633_v20  ;;  %v1443_v54 = vpop.eup %1442 }
 0x186   :  { %v609_v52 = vmul.f32 0.5, %v605_v29  ;;  %v616_v53 = vmul.f32 %v1441_v48, %v608_v27 }
 0x187   :  { %1227 = vmatmul.mubr.msk.bf16.vlgmr.msra.gmra.mrb[0].mxu1 %vm1676_vm4, %v1226_v49 }
 0x188   :  { %1014 = vmatpush1.bf16.msra.mxu1 %v1404_v25  ;;  %v617_v56 = vmul.f32 %v1443_v54, %v609_v52  ;;  %v637_v57 = vrot.slane %v616_v53, 1  ;;  %v625_v59 = vrot.slane %v616_v53, 7 }
 0x189   :  { %1015 = vmatprep.subr.bf16.mxu1 %v1409_v50 }
 0x18a   :  { %v638_v62 = vsel %vm145_vm0, %v635_v43, %v637_v57  ;;  %v658_v63 = vpack.c.bf16 %v617_v56, %v616_v53  ;;  %v626_v0 = vsel %vm132_vm1, %v623_v42, %v625_v59  ;;  %v627_v1 = vrot.slane %v617_v56, 7 }
 0x18b   :  { %v1234_v2 = vpack.c.bf16 %v638_v62, %v636_v23  ;;  %v639_v3 = vrot.slane %v617_v56, 1 }
 0x18c   :  { %1016 = vmatpush1.bf16.msra.mxu1 %v1407_v55  ;;  %1002 = vmatprep.mubr.bf16.mxu1 %v658_v63  ;;  %v628_v6 = vsel %vm132_vm1, %v625_v59, %v627_v1 }
 0x18d   :  { %1017 = vmatprep.subr.bf16.mxu1 %v1412_v60  ;;  %v1230_v5 = vpack.c.bf16 %v628_v6, %v626_v0  ;;  %v640_v8 = vsel %vm145_vm0, %v637_v57, %v639_v3  ;;  %v645_v9 = vsel %vm145_vm0, %v639_v3, 0.0 }
 0x18e   :  { %v1238_v10 = vpack.c.bf16 %v645_v9, %v640_v8 }
 0x18f   :  { %1231 = vmatmul.mubr.msk.bf16.gmra.mrb[4].mxu1 %vm1689_vm6, %v1230_v5 }
 0x190   :  { %1018 = vmatpush1.bf16.msra.mxu1 %v1410_v4  ;;  %1045 = vmatprep.mubr.bf16.mxu1 %v1560_v26 }
 0x191   :  { %1019 = vmatprep.subr.bf16.mxu1 %v1415_v7 }
 0x194   :  { %1020 = vmatpush1.bf16.msra.mxu1 %v1413_v11 }
 0x195   :  { %1021 = vmatprep.subr.bf16.mxu1 %v1418_v12 }
 0x198   :  { %1022 = vmatpush1.bf16.msra.mxu1 %v1416_v13 }
 0x199   :  { %1023 = vmatprep.subr.bf16.mxu1 %v1421_v14 }
 0x19c   :  { %1024 = vmatpush1.bf16.msra.mxu1 %v1419_v15 }
 0x19d   :  { %1025 = vmatprep.subr.bf16.mxu1 %v1424_v16 }
 0x1a0   :  { %1026 = vmatpush1.bf16.msra.mxu1 %v1422_v17 }
 0x1a1   :  { %1027 = vmatprep.subr.bf16.mxu1 %v1427_v18 }
 0x1a4   :  { %1028 = vmatpush1.bf16.msra.mxu1 %v1425_v21 }
 0x1a7   :  { %1235 = vmatmul.mubr.msk.bf16.vlgmr.msra.gmra.mrb[0].mxu1 %vm1700_vm8, %v1234_v2 }
 0x1a8   :  { %1055 = vmatprep.mubr.bf16.mxu1 %v1560_v26 }
 0x1af   :  { %1239 = vmatmul.mubr.msk.bf16.gmra.mrb[4].mxu1 %vm1715_vm10, %v1238_v10 }
 0x27a   :  { %v1047_v24 = vpop.f32.mrb[0].mxu1 }
 0x27b   :  { %v1252_v28 = vadd.f32 %v1047_v24, %v713_v22  ;;  %v1049_v31 = vpop.f32.mrb[1].mxu1 }
 0x27c   :  { %v1051_v41 = vpop.f32.mrb[2].mxu1  ;;  %v1253_v46 = vadd.f32 %v1049_v31, %v717_v30 }
 0x27d   :  { %v1066_v32 = vmul.f32 0.5, %v1252_v28  ;;  %v1254_v33 = vadd.f32 %v1051_v41, %v713_v22  ;;  %v1053_v26 = vpop.f32.mrb[3].mxu1 }
 0x27e   :  { %v1255_v35 = vadd.f32 %v1053_v26, %v717_v30 }
 0x27f   :  { %1444 = vtanh.f32 %v1066_v32  ;;  %v1067_v34 = vmul.f32 0.5, %v1254_v33 }
 0x281   :  { %1446 = vtanh.f32 %v1067_v34 }
 0x282   :  { %v1057_v36 = vpop.f32.mrb[4].mxu1  ;;  %1448 = vtanh.f32 %v1253_v46 }
 0x283   :  { %v1256_v37 = vadd.f32 %v1057_v36, %v713_v22  ;;  %v1059_v38 = vpop.f32.mrb[5].mxu1  ;;  %1450 = vtanh.f32 %v1255_v35 }
 0x284   :  { %v1061_v58 = vpop.f32.mrb[6].mxu1  ;;  %v1257_v61 = vadd.f32 %v1059_v38, %v717_v30 }
 0x285   :  { %v1068_v39 = vmul.f32 0.5, %v1256_v37  ;;  %v1258_v40 = vadd.f32 %v1061_v58, %v713_v22  ;;  %v1063_v51 = vpop.f32.mrb[7].mxu1 }
 0x286   :  { %v1259_v44 = vadd.f32 %v1063_v51, %v717_v30 }
 0x287   :  { %1452 = vtanh.f32 %v1068_v39  ;;  %v1069_v42 = vmul.f32 0.5, %v1258_v40 }
 0x289   :  { %v1445_v43 = vpop.eup %1444  ;;  %1454 = vtanh.f32 %v1069_v42 }
 0x28a   :  { %v1074_v45 = vadd.f32 1.0, %v1445_v43  ;;  %1456 = vtanh.f32 %v1257_v61 }
 0x28b   :  { %v1447_v20 = vpop.eup %1446  ;;  %1458 = vtanh.f32 %v1259_v44 }
 0x28c   :  { %v1078_v27 = vmul.f32 0.5, %v1074_v45  ;;  %v1075_v29 = vadd.f32 1.0, %v1447_v20  ;;  %v1449_v23 = vpop.eup %1448 }
 0x28d   :  { %v1451_v48 = vpop.eup %1450 }
 0x28e   :  { %v1079_v25 = vmul.f32 0.5, %v1075_v29  ;;  %v1086_v47 = vmul.f32 %v1449_v23, %v1078_v27 }
 0x290   :  { %v1087_v49 = vmul.f32 %v1451_v48, %v1079_v25  ;;  %1090 = vst [vmem:[#allocation8] sm:$0xff] %v1086_v47 }
 0x291   :  { %v1453_v50 = vpop.eup %1452 }
 0x292   :  { %v1076_v52 = vadd.f32 1.0, %v1453_v50  ;;  %1091 = vst [vmem:[#allocation8 + $0x8] sm:$0xff] %v1087_v49 }
 0x293   :  { %v1455_v53 = vpop.eup %1454 }
 0x294   :  { %v1080_v54 = vmul.f32 0.5, %v1076_v52  ;;  %v1077_v55 = vadd.f32 1.0, %v1455_v53  ;;  %v1457_v56 = vpop.eup %1456 }
 0x295   :  { %v1459_v60 = vpop.eup %1458 }
 0x296   :  { %v1081_v57 = vmul.f32 0.5, %v1077_v55  ;;  %v1088_v59 = vmul.f32 %v1457_v56, %v1080_v54 }
 0x298   :  { %v1089_v62 = vmul.f32 %v1459_v60, %v1081_v57  ;;  %1092 = vst [vmem:[#allocation8 + $0x10] sm:$0xff] %v1088_v59 }
 0x29a   :  { %1093 = vst [vmem:[#allocation8 + $0x18] sm:$0xff] %v1089_v62 }
 0x29b   :  { %1537 = shalt.err (!%p1534_p0)
}
 0x29c   :  { %s1538_s12 = scalar_lea.hbm %s1775_s5, 512 }
 0x29d   :  { %p1539_p1 = scmp.ne.s32.totalorder %s1775_s5, %s1538_s12  ;;  %p1542_p2 = scmp.lt.u32.totalorder %s1538_s12, %s1775_s5 }
 0x29f   :  { %p1544_p3 = pnand %p1542_p2, %p1539_p1 }
 0x2a1   :  { %1547 = shalt.err (!%p1544_p3)
}
 0x2a2   :  { %1105 = dma.vmem_to_hbm [thread:$0]  %s1100_s8, 512, %s1775_s5, [#allocation4], %s1556_s30, %s1556_s30, %s1557_s6  }
 0x2a3   :  { %1552 = dma.done.wait [#allocation4], 512  }
 0x2a4   :  { %1553 = vsyncadd [#allocation4], 4294966784 }
 0x2a5   :  { %1109 = vsyncpa [#allocation3], 1 }
 0x2a6   :  { %1110 = vsyncpa [#allocation6], 1 }
 0x2a7   :  { %1111 = vsyncpa [#allocation4], 1 }

</bundles_post_ra>
